<compile_context>
chip_gen: v7x
topology: tpu7x:2x2x1
jax: 0.10.0
libtpu: 0.0.40
codegen_flags: <defaults>
</compile_context>

<pallas_src>
import functools

import numpy as np
import jax
import jax.numpy as jnp
from jax.experimental import pallas as pl
from jax.experimental.pallas import tpu as pltpu

# torchvision rgb_to_grayscale weights
_GRAY_R, _GRAY_G, _GRAY_B = 0.2989, 0.587, 0.114

_LANE = 128
_SUBLANE = 8
_F32_BYTES = 4


# ----------------------------- per-op math helpers -----------------------------

def _grayscale(r, g, b):
    return _GRAY_R * r + _GRAY_G * g + _GRAY_B * b


def _blend_clip(x, f, offset):
    # clamp(f * x + offset, 0, 1) with offset = (1 - f) * <other>
    return jnp.clip(f * x + offset, 0.0, 1.0)


def _adjust_brightness(r, g, b, f):
    clip = lambda x: jnp.clip(f * x, 0.0, 1.0)
    return clip(r), clip(g), clip(b)


def _adjust_contrast(r, g, b, f, true_hw):
    # mean of grayscale over the whole image; padded pixels are still exactly zero
    # here (zero is a fixed point of brightness/saturation/hue), so summing the
    # padded tile and dividing by the true HW is exact.
    gray = _grayscale(r, g, b)                                         # (Bt, rows, 128)
    mean = jnp.sum(gray, axis=(1, 2), keepdims=True) * (1.0 / true_hw)  # (Bt, 1, 1)
    offset = (1.0 - f) * mean                # hoisted: computed once, reused 3x
    return _blend_clip(r, f, offset), _blend_clip(g, f, offset), _blend_clip(b, f, offset)


def _adjust_saturation(r, g, b, f):
    offset = (1.0 - f) * _grayscale(r, g, b)   # hoisted full-block term (computed once)
    return _blend_clip(r, f, offset), _blend_clip(g, f, offset), _blend_clip(b, f, offset)


def _rgb2hsv(r, g, b):
    # torchvision _rgb2hsv with: 2 approx reciprocals (EUP) instead of 4 divides,
    # and fmod(h/6 + 1, 1) replaced by frac(h/6) (equivalent for h in (-1, 5]).
    maxc = jnp.maximum(jnp.maximum(r, g), b)
    minc = jnp.minimum(jnp.minimum(r, g), b)
    eqc = maxc == minc
    cr = maxc - minc
    ones = jnp.ones_like(maxc)
    inv_max = pl.reciprocal(jnp.where(eqc, ones, maxc), approx=True)
    inv_cr = pl.reciprocal(jnp.where(eqc, ones, cr), approx=True)
    s = cr * inv_max
    rc = (maxc - r) * inv_cr
    gc = (maxc - g) * inv_cr
    bc = (maxc - b) * inv_cr
    hr = jnp.where(maxc == r, bc - gc, 0.0)
    hg = jnp.where((maxc == g) & (maxc != r), 2.0 + rc - bc, 0.0)
    hb = jnp.where((maxc != g) & (maxc != r), 4.0 + gc - rc, 0.0)
    h = (hr + hg + hb) * (1.0 / 6.0)
    h = h - jnp.floor(h)                      # == fmod(h + 1, 1) for the range above
    return h, s, maxc


def _hsv2rgb(h, s, v):
    # Closed-form HSV->RGB (k-formula): chan(n) = v - v*s*clip(min(k, 4-k), 0, 1),
    # k = (n + 6h) mod 6.  Mathematically equivalent to the sector select-chain but
    # ~half the VALU ops; v,s in [0,1] so the result is already in [~0, 1].
    h6 = h * 6.0
    vs = v * s

    def chan(n):
        k = h6 + n                                 # k in [n, 6 + n), n in {1,3,5}
        k = jnp.where(k >= 6.0, k - 6.0, k)        # k mod 6
        w = jnp.clip(jnp.minimum(k, 4.0 - k), 0.0, 1.0)
        return v - vs * w

    return chan(5.0), chan(3.0), chan(1.0)


def _adjust_hue(r, g, b, f):
    h, s, v = _rgb2hsv(r, g, b)
    h = h + f
    h = h - jnp.floor(h)                      # python-style mod 1.0, result in [0, 1)
    return _hsv2rgb(h, s, v)


def _apply_op(fn_id, r, g, b, f, true_hw):
    if fn_id == 0:
        return _adjust_brightness(r, g, b, f)
    if fn_id == 1:
        return _adjust_contrast(r, g, b, f, true_hw)
    if fn_id == 2:
        return _adjust_saturation(r, g, b, f)
    return _adjust_hue(r, g, b, f)


# ----------------------------------- kernels ------------------------------------

def _jitter_whole_kernel(factors_ref, x_ref, o_ref, *, fn_order, true_hw):
    # x_ref / o_ref: (Bt, 3, rows, 128); factors_ref: (4,) f32 in SMEM.
    r = x_ref[:, 0, :, :].astype(jnp.float32)
    g = x_ref[:, 1, :, :].astype(jnp.float32)
    b = x_ref[:, 2, :, :].astype(jnp.float32)

    for fn_id in fn_order:                 # static (compile-time) permutation
        f = factors_ref[fn_id]             # scalar read from SMEM
        r, g, b = _apply_op(fn_id, r, g, b, f, true_hw)

    o_ref[:, 0, :, :] = r.astype(o_ref.dtype)
    o_ref[:, 1, :, :] = g.astype(o_ref.dtype)
    o_ref[:, 2, :, :] = b.astype(o_ref.dtype)


def _pre_contrast_kernel(factors_ref, x_ref, inter_ref, sums_ref, *, pre_order):
    # Spatially tiled pass: ops before contrast + per-lane grayscale partial sums.
    # x_ref/inter_ref: (1, 3, rows_t, 128); sums_ref: (1, 1, 1, 128).
    r = x_ref[:, 0, :, :].astype(jnp.float32)
    g = x_ref[:, 1, :, :].astype(jnp.float32)
    b = x_ref[:, 2, :, :].astype(jnp.float32)

    for fn_id in pre_order:                # never contains contrast (fn_id 1)
        f = factors_ref[fn_id]
        r, g, b = _apply_op(fn_id, r, g, b, f, 1.0)

    inter_ref[:, 0, :, :] = r.astype(inter_ref.dtype)
    inter_ref[:, 1, :, :] = g.astype(inter_ref.dtype)
    inter_ref[:, 2, :, :] = b.astype(inter_ref.dtype)

    # Lane-dense partial sums (sublane reduce only); wrapper finishes the reduction.
    lane_sums = jnp.sum(_grayscale(r, g, b), axis=(0, 1))       # (128,)
    sums_ref[...] = lane_sums.reshape(1, 1, 1, _LANE)


def _post_contrast_kernel(factors_ref, means_ref, x_ref, o_ref, *, post_order):
    # Spatially tiled pass: contrast blend (per-image mean from SMEM) + remaining ops.
    n = pl.program_id(0)
    r = x_ref[:, 0, :, :].astype(jnp.float32)
    g = x_ref[:, 1, :, :].astype(jnp.float32)
    b = x_ref[:, 2, :, :].astype(jnp.float32)

    f = factors_ref[1]
    offset = (1.0 - f) * means_ref[n]      # scalar, hoisted out of the 3 blends
    r = _blend_clip(r, f, offset)
    g = _blend_clip(g, f, offset)
    b = _blend_clip(b, f, offset)

    for fn_id in post_order:
        fct = factors_ref[fn_id]
        r, g, b = _apply_op(fn_id, r, g, b, fct, 1.0)

    o_ref[:, 0, :, :] = r.astype(o_ref.dtype)
    o_ref[:, 1, :, :] = g.astype(o_ref.dtype)
    o_ref[:, 2, :, :] = b.astype(o_ref.dtype)


# ---------------------------------- wrappers -------------------------------------

def _color_jitter_whole(x, factors, fn_order, true_hw, target_block_bytes):
    """Small-image path: whole image per block, Bt images folded per grid step."""
    n, c, rows, _ = x.shape
    per_img_bytes = c * rows * _LANE * x.dtype.itemsize
    bt_cap = max(1, target_block_bytes // per_img_bytes)
    min_steps = 2 if n >= 2 else 1          # keep both v7x TensorCores fed
    bt = int(max(1, min(bt_cap, -(-n // min_steps))))
    n_pad = -(-n // bt) * bt                # pad batch; no divisor constraint on N
    if n_pad != n:
        x = jnp.pad(x, ((0, n_pad - n), (0, 0), (0, 0), (0, 0)))
    grid = (n_pad // bt,)

    kernel = functools.partial(_jitter_whole_kernel,
                               fn_order=fn_order, true_hw=float(true_hw))
    out = pl.pallas_call(
        kernel,
        out_shape=jax.ShapeDtypeStruct((n_pad, c, rows, _LANE), x.dtype),
        grid_spec=pl.GridSpec(
            grid=grid,
            in_specs=[
                pl.BlockSpec(memory_space=pltpu.MemorySpace.SMEM),            # factors
                pl.BlockSpec((bt, c, rows, _LANE), lambda i: (i, 0, 0, 0)),   # images
            ],
            out_specs=pl.BlockSpec((bt, c, rows, _LANE), lambda i: (i, 0, 0, 0)),
        ),
        compiler_params=pltpu.CompilerParams(dimension_semantics=("parallel",)),
    )(factors, x)
    return out[:n]


def _color_jitter_tiled(x, factors, fn_order, true_hw, rows_t):
    """Large-image path: spatial tiling with the contrast mean split across 2 calls."""
    n, c, rows, _ = x.shape                 # rows is a multiple of rows_t
    t = rows // rows_t
    grid = (n, t)
    img_spec = pl.BlockSpec((1, c, rows_t, _LANE), lambda i, s: (i, 0, s, 0))
    sums_spec = pl.BlockSpec((1, 1, 1, _LANE), lambda i, s: (i, s, 0, 0))
    smem_spec = pl.BlockSpec(memory_space=pltpu.MemorySpace.SMEM)
    par2 = pltpu.CompilerParams(dimension_semantics=("parallel", "parallel"))

    fn_order = tuple(fn_order)
    if 1 in fn_order:
        ci = fn_order.index(1)
        pre, post = fn_order[:ci], fn_order[ci + 1:]
    else:
        pre, post = fn_order, None

    inter, sums = pl.pallas_call(
        functools.partial(_pre_contrast_kernel, pre_order=pre),
        out_shape=(jax.ShapeDtypeStruct((n, c, rows, _LANE), x.dtype),
                   jax.ShapeDtypeStruct((n, t, 1, _LANE), jnp.float32)),
        grid_spec=pl.GridSpec(
            grid=grid,
            in_specs=[smem_spec, img_spec],
            out_specs=(img_spec, sums_spec),
        ),
        compiler_params=par2,
    )(factors, x)

    if post is None:                        # contrast not in the chain
        return inter

    means = (jnp.sum(sums.reshape(n, t * _LANE), axis=1)
             * jnp.float32(1.0 / true_hw)).astype(jnp.float32)

    out = pl.pallas_call(
        functools.partial(_post_contrast_kernel, post_order=post),
        out_shape=jax.ShapeDtypeStruct((n, c, rows, _LANE), x.dtype),
        grid_spec=pl.GridSpec(
            grid=grid,
            in_specs=[smem_spec, smem_spec, img_spec],
            out_specs=img_spec,
        ),
        compiler_params=par2,
    )(factors, means, inter)
    return out


def color_jitter(img, factors, fn_order, *, target_block_bytes=1 << 20):
    """img: (N, 3, H, W) float32 in [0,1]; factors: (4,) f32 indexed by fn_id
    [brightness, contrast, saturation, hue]; fn_order: static permutation of 0..3.

    target_block_bytes ~1 MiB is a safe default for v5e's 16 MiB scoped VMEM; it can
    be raised to 2-3 MiB on v6e/v7x (headroom exists) if per-step overhead shows up.
    """
    n, c, h, w = img.shape
    assert c == 3, "ColorJitter expects RGB images"
    hw = h * w
    fn_order = tuple(int(i) for i in fn_order)
    factors = jnp.asarray(factors, jnp.float32)

    tile = _SUBLANE * _LANE
    rows_needed = -(-(-(-hw // _LANE)) // _SUBLANE) * _SUBLANE   # rows, 8-aligned
    per_img_bytes = c * rows_needed * _LANE * _F32_BYTES

    if per_img_bytes <= target_block_bytes:
        # Whole image fits in one block: single-call path with batch folding.
        hw_pad = -(-hw // tile) * tile
        rows = hw_pad // _LANE
        x = img.reshape(n, c, hw).astype(jnp.float32)
        if hw_pad != hw:
            x = jnp.pad(x, ((0, 0), (0, 0), (0, hw_pad - hw)))
        x = x.reshape(n, c, rows, _LANE)
        out = _color_jitter_whole(x, factors, fn_order, hw, target_block_bytes)
    else:
        # Large image: spatial tiling + contrast split (VMEM-safe on all chips).
        rows_cap = max(_SUBLANE,
                       (target_block_bytes // (c * _LANE * _F32_BYTES))
                       // _SUBLANE * _SUBLANE)
        rows_t = min(rows_cap, rows_needed)
        rows = -(-rows_needed // rows_t) * rows_t
        hw_pad = rows * _LANE
        x = img.reshape(n, c, hw).astype(jnp.float32)
        if hw_pad != hw:
            x = jnp.pad(x, ((0, 0), (0, 0), (0, hw_pad - hw)))
        x = x.reshape(n, c, rows, _LANE)
        out = _color_jitter_tiled(x, factors, fn_order, hw, rows_t)

    out = out.reshape(n, c, rows * _LANE)[:, :, :hw].reshape(n, c, h, w)
    return out.astype(img.dtype)


# ------------------------------------- demo --------------------------------------

if __name__ == "__main__":
    # Module "parameters": brightness/contrast/saturation=0.4 -> [0.6,1.4]; hue=0.1
    brightness_rng = (0.6, 1.4)
    contrast_rng = (0.6, 1.4)
    saturation_rng = (0.6, 1.4)
    hue_rng = (-0.1, 0.1)

    key = jax.random.PRNGKey(0)
    k_img, k_img2, k_perm, kb, kc, ks, kh = jax.random.split(key, 7)

    # Small NCHW input, values in [0, 1] like a normalized RGB image tensor.
    N, C, H, W = 2, 3, 16, 16
    img = jax.random.uniform(k_img, (N, C, H, W), dtype=jnp.float32)

    # fn_idx = torch.randperm(4) -> deterministic permutation (static at trace time)
    fn_order = tuple(int(i) for i in np.asarray(jax.random.permutation(k_perm, 4)))

    # Random factors, one per transform id (brightness, contrast, saturation, hue).
    bf = jax.random.uniform(kb, (), minval=brightness_rng[0], maxval=brightness_rng[1])
    cf = jax.random.uniform(kc, (), minval=contrast_rng[0], maxval=contrast_rng[1])
    sf = jax.random.uniform(ks, (), minval=saturation_rng[0], maxval=saturation_rng[1])
    hf = jax.random.uniform(kh, (), minval=hue_rng[0], maxval=hue_rng[1])
    factors = jnp.stack([bf, cf, sf, hf]).astype(jnp.float32)

    out_img = color_jitter(img, factors, fn_order)
    fn_id = jnp.int32(fn_order[-1])         # module returns [img, fn_id]
    result = [out_img, fn_id]
    jax.block_until_ready(result[0])

    assert result[0].shape == (N, C, H, W)
    assert result[0].dtype == jnp.float32
    assert bool(jnp.all(jnp.isfinite(result[0])))
    # approx reciprocal + closed-form hsv2rgb can undershoot 0 by ~1e-3 at most
    assert bool(jnp.all(result[0] >= -5e-3)) and bool(jnp.all(result[0] <= 1.0 + 1e-6))

    # Exercise the spatially tiled, contrast-split (large-image) path on a slightly
    # bigger image by forcing a tiny block budget, and check it agrees with the
    # whole-image path (differences only from the contrast-mean summation order).
    img2 = jax.random.uniform(k_img2, (N, C, 64, 64), dtype=jnp.float32)
    out_whole = color_jitter(img2, factors, fn_order)
    out_tiled = color_jitter(img2, factors, fn_order,
                             target_block_bytes=3 * _SUBLANE * _LANE * _F32_BYTES)
    jax.block_until_ready(out_tiled)
    assert out_tiled.shape == (N, C, 64, 64)
    assert bool(jnp.allclose(out_whole, out_tiled, atol=5e-5))

    print("KERNEL_OK")
</pallas_src>

<mosaic_0001>
module attributes {stable_mosaic.version = 11 : i64} {
  func.func @_jitter_whole_kernel(%arg0: i32, %arg1: memref<4xf32, #tpu.memory_space<smem>>, %arg2: memref<1x3x8x128xf32, #tpu.memory_space<vmem>>, %arg3: memref<1x3x8x128xf32, #tpu.memory_space<vmem>>) attributes {dimension_semantics = [#tpu.dimension_semantics<parallel>], iteration_bounds = array<i64: 2>, scalar_prefetch = 0 : i64, scratch_operands = 0 : i64, tpu.core_type = #tpu.core_type<tc>, window_params = [{transform_indices = @transform_0, window_bounds = array<i64: 4>}, {transform_indices = @transform_1, window_bounds = array<i64: 1, 3, 8, 128>}, {transform_indices = @transform_2, window_bounds = array<i64: 1, 3, 8, 128>}]} {
    %c0 = arith.constant 0 : index
    %c0_0 = arith.constant 0 : index
    %c0_1 = arith.constant 0 : index
    %c0_2 = arith.constant 0 : index
    %0 = vector.load %arg2[%c0, %c0_0, %c0_1, %c0_2] : memref<1x3x8x128xf32, #tpu.memory_space<vmem>>, vector<1x1x8x128xf32>
    %1 = vector.shape_cast %0 : vector<1x1x8x128xf32> to vector<1x8x128xf32>
    %c0_3 = arith.constant 0 : index
    %c1 = arith.constant 1 : index
    %c0_4 = arith.constant 0 : index
    %c0_5 = arith.constant 0 : index
    %2 = vector.load %arg2[%c0_3, %c1, %c0_4, %c0_5] : memref<1x3x8x128xf32, #tpu.memory_space<vmem>>, vector<1x1x8x128xf32>
    %3 = vector.shape_cast %2 : vector<1x1x8x128xf32> to vector<1x8x128xf32>
    %c0_6 = arith.constant 0 : index
    %c2 = arith.constant 2 : index
    %c0_7 = arith.constant 0 : index
    %c0_8 = arith.constant 0 : index
    %4 = vector.load %arg2[%c0_6, %c2, %c0_7, %c0_8] : memref<1x3x8x128xf32, #tpu.memory_space<vmem>>, vector<1x1x8x128xf32>
    %5 = vector.shape_cast %4 : vector<1x1x8x128xf32> to vector<1x8x128xf32>
    %c3 = arith.constant 3 : index
    %6 = memref.load %arg1[%c3] : memref<4xf32, #tpu.memory_space<smem>>
    %7 = arith.maximumf %1, %3 : vector<1x8x128xf32>
    %8 = arith.maximumf %7, %5 : vector<1x8x128xf32>
    %9 = arith.minimumf %1, %3 : vector<1x8x128xf32>
    %10 = arith.minimumf %9, %5 : vector<1x8x128xf32>
    %11 = arith.cmpf oeq, %8, %10 : vector<1x8x128xf32>
    %12 = arith.subf %8, %10 : vector<1x8x128xf32>
    %cst = arith.constant 1.000000e+00 : f32
    %13 = vector.broadcast %cst : f32 to vector<1x8x128xf32>
    %14 = arith.select %11, %13, %8 : vector<1x8x128xi1>, vector<1x8x128xf32>
    %15 = tpu.reciprocal %14 {approx = true} : vector<1x8x128xf32> -> vector<1x8x128xf32>
    %16 = arith.select %11, %13, %12 : vector<1x8x128xi1>, vector<1x8x128xf32>
    %17 = tpu.reciprocal %16 {approx = true} : vector<1x8x128xf32> -> vector<1x8x128xf32>
    %18 = arith.mulf %12, %15 : vector<1x8x128xf32>
    %19 = arith.subf %8, %1 : vector<1x8x128xf32>
    %20 = arith.mulf %19, %17 : vector<1x8x128xf32>
    %21 = arith.subf %8, %3 : vector<1x8x128xf32>
    %22 = arith.mulf %21, %17 : vector<1x8x128xf32>
    %23 = arith.subf %8, %5 : vector<1x8x128xf32>
    %24 = arith.mulf %23, %17 : vector<1x8x128xf32>
    %25 = arith.cmpf oeq, %8, %1 : vector<1x8x128xf32>
    %26 = arith.subf %24, %22 : vector<1x8x128xf32>
    %cst_9 = arith.constant 0.000000e+00 : f32
    %27 = vector.broadcast %cst_9 : f32 to vector<1x8x128xf32>
    %28 = arith.select %25, %26, %27 : vector<1x8x128xi1>, vector<1x8x128xf32>
    %29 = arith.cmpf oeq, %8, %3 : vector<1x8x128xf32>
    %30 = arith.cmpf one, %8, %1 : vector<1x8x128xf32>
    %31 = arith.andi %29, %30 : vector<1x8x128xi1>
    %cst_10 = arith.constant 2.000000e+00 : f32
    %32 = vector.broadcast %cst_10 : f32 to vector<1x8x128xf32>
    %33 = arith.addf %32, %20 : vector<1x8x128xf32>
    %34 = arith.subf %33, %24 : vector<1x8x128xf32>
    %cst_11 = arith.constant 0.000000e+00 : f32
    %35 = vector.broadcast %cst_11 : f32 to vector<1x8x128xf32>
    %36 = arith.select %31, %34, %35 : vector<1x8x128xi1>, vector<1x8x128xf32>
    %37 = arith.cmpf one, %8, %3 : vector<1x8x128xf32>
    %38 = arith.cmpf one, %8, %1 : vector<1x8x128xf32>
    %39 = arith.andi %37, %38 : vector<1x8x128xi1>
    %cst_12 = arith.constant 4.000000e+00 : f32
    %40 = vector.broadcast %cst_12 : f32 to vector<1x8x128xf32>
    %41 = arith.addf %40, %22 : vector<1x8x128xf32>
    %42 = arith.subf %41, %20 : vector<1x8x128xf32>
    %cst_13 = arith.constant 0.000000e+00 : f32
    %43 = vector.broadcast %cst_13 : f32 to vector<1x8x128xf32>
    %44 = arith.select %39, %42, %43 : vector<1x8x128xi1>, vector<1x8x128xf32>
    %45 = arith.addf %28, %36 : vector<1x8x128xf32>
    %46 = arith.addf %45, %44 : vector<1x8x128xf32>
    %cst_14 = arith.constant 0.166666672 : f32
    %47 = vector.broadcast %cst_14 : f32 to vector<1x8x128xf32>
    %48 = arith.mulf %46, %47 : vector<1x8x128xf32>
    %49 = math.floor %48 : vector<1x8x128xf32>
    %50 = arith.subf %48, %49 : vector<1x8x128xf32>
    %51 = vector.broadcast %6 : f32 to vector<1x8x128xf32>
    %52 = arith.addf %50, %51 : vector<1x8x128xf32>
    %53 = math.floor %52 : vector<1x8x128xf32>
    %54 = arith.subf %52, %53 : vector<1x8x128xf32>
    %cst_15 = arith.constant 6.000000e+00 : f32
    %55 = vector.broadcast %cst_15 : f32 to vector<1x8x128xf32>
    %56 = arith.mulf %54, %55 : vector<1x8x128xf32>
    %57 = arith.mulf %8, %18 : vector<1x8x128xf32>
    %cst_16 = arith.constant 5.000000e+00 : f32
    %58 = vector.broadcast %cst_16 : f32 to vector<1x8x128xf32>
    %59 = arith.addf %56, %58 : vector<1x8x128xf32>
    %cst_17 = arith.constant 6.000000e+00 : f32
    %60 = vector.broadcast %cst_17 : f32 to vector<1x8x128xf32>
    %61 = arith.cmpf oge, %59, %60 : vector<1x8x128xf32>
    %cst_18 = arith.constant 6.000000e+00 : f32
    %62 = vector.broadcast %cst_18 : f32 to vector<1x8x128xf32>
    %63 = arith.subf %59, %62 : vector<1x8x128xf32>
    %64 = arith.select %61, %63, %59 : vector<1x8x128xi1>, vector<1x8x128xf32>
    %cst_19 = arith.constant 4.000000e+00 : f32
    %65 = vector.broadcast %cst_19 : f32 to vector<1x8x128xf32>
    %66 = arith.subf %65, %64 : vector<1x8x128xf32>
    %67 = arith.minimumf %64, %66 : vector<1x8x128xf32>
    %cst_20 = arith.constant 0.000000e+00 : f32
    %cst_21 = arith.constant 1.000000e+00 : f32
    %68 = vector.broadcast %cst_20 : f32 to vector<1x8x128xf32>
    %69 = arith.maximumf %68, %67 : vector<1x8x128xf32>
    %70 = vector.broadcast %cst_21 : f32 to vector<1x8x128xf32>
    %71 = arith.minimumf %70, %69 : vector<1x8x128xf32>
    %72 = arith.mulf %57, %71 : vector<1x8x128xf32>
    %73 = arith.subf %8, %72 : vector<1x8x128xf32>
    %cst_22 = arith.constant 3.000000e+00 : f32
    %74 = vector.broadcast %cst_22 : f32 to vector<1x8x128xf32>
    %75 = arith.addf %56, %74 : vector<1x8x128xf32>
    %cst_23 = arith.constant 6.000000e+00 : f32
    %76 = vector.broadcast %cst_23 : f32 to vector<1x8x128xf32>
    %77 = arith.cmpf oge, %75, %76 : vector<1x8x128xf32>
    %cst_24 = arith.constant 6.000000e+00 : f32
    %78 = vector.broadcast %cst_24 : f32 to vector<1x8x128xf32>
    %79 = arith.subf %75, %78 : vector<1x8x128xf32>
    %80 = arith.select %77, %79, %75 : vector<1x8x128xi1>, vector<1x8x128xf32>
    %cst_25 = arith.constant 4.000000e+00 : f32
    %81 = vector.broadcast %cst_25 : f32 to vector<1x8x128xf32>
    %82 = arith.subf %81, %80 : vector<1x8x128xf32>
    %83 = arith.minimumf %80, %82 : vector<1x8x128xf32>
    %cst_26 = arith.constant 0.000000e+00 : f32
    %cst_27 = arith.constant 1.000000e+00 : f32
    %84 = vector.broadcast %cst_26 : f32 to vector<1x8x128xf32>
    %85 = arith.maximumf %84, %83 : vector<1x8x128xf32>
    %86 = vector.broadcast %cst_27 : f32 to vector<1x8x128xf32>
    %87 = arith.minimumf %86, %85 : vector<1x8x128xf32>
    %88 = arith.mulf %57, %87 : vector<1x8x128xf32>
    %89 = arith.subf %8, %88 : vector<1x8x128xf32>
    %cst_28 = arith.constant 1.000000e+00 : f32
    %90 = vector.broadcast %cst_28 : f32 to vector<1x8x128xf32>
    %91 = arith.addf %56, %90 : vector<1x8x128xf32>
    %cst_29 = arith.constant 6.000000e+00 : f32
    %92 = vector.broadcast %cst_29 : f32 to vector<1x8x128xf32>
    %93 = arith.cmpf oge, %91, %92 : vector<1x8x128xf32>
    %cst_30 = arith.constant 6.000000e+00 : f32
    %94 = vector.broadcast %cst_30 : f32 to vector<1x8x128xf32>
    %95 = arith.subf %91, %94 : vector<1x8x128xf32>
    %96 = arith.select %93, %95, %91 : vector<1x8x128xi1>, vector<1x8x128xf32>
    %cst_31 = arith.constant 4.000000e+00 : f32
    %97 = vector.broadcast %cst_31 : f32 to vector<1x8x128xf32>
    %98 = arith.subf %97, %96 : vector<1x8x128xf32>
    %99 = arith.minimumf %96, %98 : vector<1x8x128xf32>
    %cst_32 = arith.constant 0.000000e+00 : f32
    %cst_33 = arith.constant 1.000000e+00 : f32
    %100 = vector.broadcast %cst_32 : f32 to vector<1x8x128xf32>
    %101 = arith.maximumf %100, %99 : vector<1x8x128xf32>
    %102 = vector.broadcast %cst_33 : f32 to vector<1x8x128xf32>
    %103 = arith.minimumf %102, %101 : vector<1x8x128xf32>
    %104 = arith.mulf %57, %103 : vector<1x8x128xf32>
    %105 = arith.subf %8, %104 : vector<1x8x128xf32>
    %c1_34 = arith.constant 1 : index
    %106 = memref.load %arg1[%c1_34] : memref<4xf32, #tpu.memory_space<smem>>
    %cst_35 = arith.constant 2.989000e-01 : f32
    %107 = vector.broadcast %cst_35 : f32 to vector<1x8x128xf32>
    %108 = arith.mulf %107, %73 : vector<1x8x128xf32>
    %cst_36 = arith.constant 5.870000e-01 : f32
    %109 = vector.broadcast %cst_36 : f32 to vector<1x8x128xf32>
    %110 = arith.mulf %109, %89 : vector<1x8x128xf32>
    %111 = arith.addf %108, %110 : vector<1x8x128xf32>
    %cst_37 = arith.constant 1.140000e-01 : f32
    %112 = vector.broadcast %cst_37 : f32 to vector<1x8x128xf32>
    %113 = arith.mulf %112, %105 : vector<1x8x128xf32>
    %114 = arith.addf %111, %113 : vector<1x8x128xf32>
    %cst_38 = arith.constant dense<0.000000e+00> : vector<1xf32>
    %115 = vector.multi_reduction <add>, %114, %cst_38 [1, 2] : vector<1x8x128xf32> to vector<1xf32>
    %116 = vector.shape_cast %115 : vector<1xf32> to vector<1x1x1xf32>
    %cst_39 = arith.constant 3.906250e-03 : f32
    %117 = vector.broadcast %cst_39 : f32 to vector<1x1x1xf32>
    %118 = arith.mulf %116, %117 : vector<1x1x1xf32>
    %cst_40 = arith.constant 1.000000e+00 : f32
    %119 = arith.subf %cst_40, %106 : f32
    %120 = vector.broadcast %119 : f32 to vector<1x1x1xf32>
    %121 = arith.mulf %120, %118 : vector<1x1x1xf32>
    %122 = vector.broadcast %106 : f32 to vector<1x8x128xf32>
    %123 = arith.mulf %122, %73 : vector<1x8x128xf32>
    %124 = vector.broadcast %121 : vector<1x1x1xf32> to vector<1x8x128xf32>
    %125 = arith.addf %123, %124 : vector<1x8x128xf32>
    %cst_41 = arith.constant 0.000000e+00 : f32
    %cst_42 = arith.constant 1.000000e+00 : f32
    %126 = vector.broadcast %cst_41 : f32 to vector<1x8x128xf32>
    %127 = arith.maximumf %126, %125 : vector<1x8x128xf32>
    %128 = vector.broadcast %cst_42 : f32 to vector<1x8x128xf32>
    %129 = arith.minimumf %128, %127 : vector<1x8x128xf32>
    %130 = vector.broadcast %106 : f32 to vector<1x8x128xf32>
    %131 = arith.mulf %130, %89 : vector<1x8x128xf32>
    %132 = vector.broadcast %121 : vector<1x1x1xf32> to vector<1x8x128xf32>
    %133 = arith.addf %131, %132 : vector<1x8x128xf32>
    %cst_43 = arith.constant 0.000000e+00 : f32
    %cst_44 = arith.constant 1.000000e+00 : f32
    %134 = vector.broadcast %cst_43 : f32 to vector<1x8x128xf32>
    %135 = arith.maximumf %134, %133 : vector<1x8x128xf32>
    %136 = vector.broadcast %cst_44 : f32 to vector<1x8x128xf32>
    %137 = arith.minimumf %136, %135 : vector<1x8x128xf32>
    %138 = vector.broadcast %106 : f32 to vector<1x8x128xf32>
    %139 = arith.mulf %138, %105 : vector<1x8x128xf32>
    %140 = vector.broadcast %121 : vector<1x1x1xf32> to vector<1x8x128xf32>
    %141 = arith.addf %139, %140 : vector<1x8x128xf32>
    %cst_45 = arith.constant 0.000000e+00 : f32
    %cst_46 = arith.constant 1.000000e+00 : f32
    %142 = vector.broadcast %cst_45 : f32 to vector<1x8x128xf32>
    %143 = arith.maximumf %142, %141 : vector<1x8x128xf32>
    %144 = vector.broadcast %cst_46 : f32 to vector<1x8x128xf32>
    %145 = arith.minimumf %144, %143 : vector<1x8x128xf32>
    %c0_47 = arith.constant 0 : index
    %146 = memref.load %arg1[%c0_47] : memref<4xf32, #tpu.memory_space<smem>>
    %147 = vector.broadcast %146 : f32 to vector<1x8x128xf32>
    %148 = arith.mulf %147, %129 : vector<1x8x128xf32>
    %cst_48 = arith.constant 0.000000e+00 : f32
    %cst_49 = arith.constant 1.000000e+00 : f32
    %149 = vector.broadcast %cst_48 : f32 to vector<1x8x128xf32>
    %150 = arith.maximumf %149, %148 : vector<1x8x128xf32>
    %151 = vector.broadcast %cst_49 : f32 to vector<1x8x128xf32>
    %152 = arith.minimumf %151, %150 : vector<1x8x128xf32>
    %153 = vector.broadcast %146 : f32 to vector<1x8x128xf32>
    %154 = arith.mulf %153, %137 : vector<1x8x128xf32>
    %cst_50 = arith.constant 0.000000e+00 : f32
    %cst_51 = arith.constant 1.000000e+00 : f32
    %155 = vector.broadcast %cst_50 : f32 to vector<1x8x128xf32>
    %156 = arith.maximumf %155, %154 : vector<1x8x128xf32>
    %157 = vector.broadcast %cst_51 : f32 to vector<1x8x128xf32>
    %158 = arith.minimumf %157, %156 : vector<1x8x128xf32>
    %159 = vector.broadcast %146 : f32 to vector<1x8x128xf32>
    %160 = arith.mulf %159, %145 : vector<1x8x128xf32>
    %cst_52 = arith.constant 0.000000e+00 : f32
    %cst_53 = arith.constant 1.000000e+00 : f32
    %161 = vector.broadcast %cst_52 : f32 to vector<1x8x128xf32>
    %162 = arith.maximumf %161, %160 : vector<1x8x128xf32>
    %163 = vector.broadcast %cst_53 : f32 to vector<1x8x128xf32>
    %164 = arith.minimumf %163, %162 : vector<1x8x128xf32>
    %c2_54 = arith.constant 2 : index
    %165 = memref.load %arg1[%c2_54] : memref<4xf32, #tpu.memory_space<smem>>
    %cst_55 = arith.constant 1.000000e+00 : f32
    %166 = arith.subf %cst_55, %165 : f32
    %cst_56 = arith.constant 2.989000e-01 : f32
    %167 = vector.broadcast %cst_56 : f32 to vector<1x8x128xf32>
    %168 = arith.mulf %167, %152 : vector<1x8x128xf32>
    %cst_57 = arith.constant 5.870000e-01 : f32
    %169 = vector.broadcast %cst_57 : f32 to vector<1x8x128xf32>
    %170 = arith.mulf %169, %158 : vector<1x8x128xf32>
    %171 = arith.addf %168, %170 : vector<1x8x128xf32>
    %cst_58 = arith.constant 1.140000e-01 : f32
    %172 = vector.broadcast %cst_58 : f32 to vector<1x8x128xf32>
    %173 = arith.mulf %172, %164 : vector<1x8x128xf32>
    %174 = arith.addf %171, %173 : vector<1x8x128xf32>
    %175 = vector.broadcast %166 : f32 to vector<1x8x128xf32>
    %176 = arith.mulf %175, %174 : vector<1x8x128xf32>
    %177 = vector.broadcast %165 : f32 to vector<1x8x128xf32>
    %178 = arith.mulf %177, %152 : vector<1x8x128xf32>
    %179 = arith.addf %178, %176 : vector<1x8x128xf32>
    %cst_59 = arith.constant 0.000000e+00 : f32
    %cst_60 = arith.constant 1.000000e+00 : f32
    %180 = vector.broadcast %cst_59 : f32 to vector<1x8x128xf32>
    %181 = arith.maximumf %180, %179 : vector<1x8x128xf32>
    %182 = vector.broadcast %cst_60 : f32 to vector<1x8x128xf32>
    %183 = arith.minimumf %182, %181 : vector<1x8x128xf32>
    %184 = vector.broadcast %165 : f32 to vector<1x8x128xf32>
    %185 = arith.mulf %184, %158 : vector<1x8x128xf32>
    %186 = arith.addf %185, %176 : vector<1x8x128xf32>
    %cst_61 = arith.constant 0.000000e+00 : f32
    %cst_62 = arith.constant 1.000000e+00 : f32
    %187 = vector.broadcast %cst_61 : f32 to vector<1x8x128xf32>
    %188 = arith.maximumf %187, %186 : vector<1x8x128xf32>
    %189 = vector.broadcast %cst_62 : f32 to vector<1x8x128xf32>
    %190 = arith.minimumf %189, %188 : vector<1x8x128xf32>
    %191 = vector.broadcast %165 : f32 to vector<1x8x128xf32>
    %192 = arith.mulf %191, %164 : vector<1x8x128xf32>
    %193 = arith.addf %192, %176 : vector<1x8x128xf32>
    %cst_63 = arith.constant 0.000000e+00 : f32
    %cst_64 = arith.constant 1.000000e+00 : f32
    %194 = vector.broadcast %cst_63 : f32 to vector<1x8x128xf32>
    %195 = arith.maximumf %194, %193 : vector<1x8x128xf32>
    %196 = vector.broadcast %cst_64 : f32 to vector<1x8x128xf32>
    %197 = arith.minimumf %196, %195 : vector<1x8x128xf32>
    %c0_65 = arith.constant 0 : index
    %c0_66 = arith.constant 0 : index
    %c0_67 = arith.constant 0 : index
    %c0_68 = arith.constant 0 : index
    %198 = vector.load %arg3[%c0_65, %c0_66, %c0_67, %c0_68] : memref<1x3x8x128xf32, #tpu.memory_space<vmem>>, vector<1x1x8x128xf32>
    %199 = vector.shape_cast %198 : vector<1x1x8x128xf32> to vector<1x8x128xf32>
    %200 = vector.shape_cast %183 : vector<1x8x128xf32> to vector<1x1x8x128xf32>
    tpu.vector_store %arg3[%c0_65, %c0_66, %c0_67, %c0_68], %200 {strides = array<i32>} : memref<1x3x8x128xf32, #tpu.memory_space<vmem>>, vector<1x1x8x128xf32>,
    %c0_69 = arith.constant 0 : index
    %c1_70 = arith.constant 1 : index
    %c0_71 = arith.constant 0 : index
    %c0_72 = arith.constant 0 : index
    %201 = vector.load %arg3[%c0_69, %c1_70, %c0_71, %c0_72] : memref<1x3x8x128xf32, #tpu.memory_space<vmem>>, vector<1x1x8x128xf32>
    %202 = vector.shape_cast %201 : vector<1x1x8x128xf32> to vector<1x8x128xf32>
    %203 = vector.shape_cast %190 : vector<1x8x128xf32> to vector<1x1x8x128xf32>
    tpu.vector_store %arg3[%c0_69, %c1_70, %c0_71, %c0_72], %203 {strides = array<i32>} : memref<1x3x8x128xf32, #tpu.memory_space<vmem>>, vector<1x1x8x128xf32>,
    %c0_73 = arith.constant 0 : index
    %c2_74 = arith.constant 2 : index
    %c0_75 = arith.constant 0 : index
    %c0_76 = arith.constant 0 : index
    %204 = vector.load %arg3[%c0_73, %c2_74, %c0_75, %c0_76] : memref<1x3x8x128xf32, #tpu.memory_space<vmem>>, vector<1x1x8x128xf32>
    %205 = vector.shape_cast %204 : vector<1x1x8x128xf32> to vector<1x8x128xf32>
    %206 = vector.shape_cast %197 : vector<1x8x128xf32> to vector<1x1x8x128xf32>
    tpu.vector_store %arg3[%c0_73, %c2_74, %c0_75, %c0_76], %206 {strides = array<i32>} : memref<1x3x8x128xf32, #tpu.memory_space<vmem>>, vector<1x1x8x128xf32>,
    return
  }
  func.func @transform_0(%arg0: i32) -> i32 {
    %c0_i32 = arith.constant 0 : i32
    %c0_i32_0 = arith.constant 0 : i32
    return %c0_i32 : i32
  }
  func.func @transform_1(%arg0: i32) -> (i32, i32, i32, i32) {
    %c0_i32 = arith.constant 0 : i32
    %c0_i32_0 = arith.constant 0 : i32
    %c0_i32_1 = arith.constant 0 : i32
    %c0_i32_2 = arith.constant 0 : i32
    return %arg0, %c0_i32, %c0_i32_0, %c0_i32_1 : i32, i32, i32, i32
  }
  func.func @transform_2(%arg0: i32) -> (i32, i32, i32, i32) {
    %c0_i32 = arith.constant 0 : i32
    %c0_i32_0 = arith.constant 0 : i32
    %c0_i32_1 = arith.constant 0 : i32
    %c0_i32_2 = arith.constant 0 : i32
    return %arg0, %c0_i32, %c0_i32_0, %c0_i32_1 : i32, i32, i32, i32
  }
}

</mosaic_0001>

<bundles_post_ra>
// kernel: tpu_custom_call.1
= control target key start
LH: loop header
LB: loop body
LE: loop exit
PB: predicated region body
PF: predicated region fallthrough
CT: control target
= control target key end

     0   :  { %7 = vsyncpa [#allocation5], 0  ;;  %s860_s0 = inlined_call_operand.hbm [shape: f32[4], index: 0, kind: input, shape index: {}]   ;;  %s861_s1 = inlined_call_operand.hbm [shape: f32[2,3,8,128], index: 1, kind: input, shape index: {}]   ;;  %s862_s2 = inlined_call_operand.hbm [shape: f32[2,3,8,128], index: 2, kind: output, shape index: {}]  }
   0x1   :  { %8 = vsyncpa [#allocation3], 0 }
   0x2   :  { %10 = vsyncpa [#allocation3 + $0x1], 0 }
   0x3   :  { %11 = vsyncpa [#allocation4], 0 }
   0x4   :  { %13 = vsyncpa [#allocation4 + $0x1], 0  ;;  %s646_s9 = smov 0   ;;  %s648_s10 = smov 0  }
   0x5   :  { %s650_s11 = smov 0   ;;  %s652_s12 = smov 0  }
   0x6 LB: > { %s667_s13 = sadd.s32 4294967295, %s622_s12   ;;  %s420_s14 = sadd.s32 4294967294, %s622_s12   ;;  %s622_s12 = sphi %s652_s12, %s882_s12   ;;  %s618_s11 = sphi %s650_s11, %s881_s11   ;;  %s614_s10 = sphi %s648_s10, %s880_s10   ;;  %s610_s9 = sphi %s646_s9, %s879_s9  }
   0x7   : > { %s671_s15 = sadd.s32 1, %s622_s12   ;;  %s47_s16 = sadd.s32 1, %s618_s11 }
   0x8   : > { %s44_s17 = ssub.s32 %s622_s12, %s671_s15  ;;  %p54_p0 = scmp.ne.s32.totalorder %s618_s11, %s614_s10 }
   0x9   : > { %p45_p1 = scmp.eq.s32.totalorder %s44_s17, 0  ;;  %p55_p2 = scmp.eq.s32.totalorder %s622_s12, 0 }
   0xa   : > { %p60_p3 = scmp.ne.s32.totalorder %s614_s10, %s610_s9  ;;  %p863_p4 = scmp.eq.s32.totalorder %s667_s13, 0 }
   0xb   : > { %s683_s18 = scalar_select %p45_p1, %s618_s11, %s47_s16  }
   0xc   : > { %p685_p5 = por %p55_p2, %p54_p0  ;;  %p691_p6 = por %p863_p4, %p60_p3 }
   0xd   : > { %p84_p7 = scmp.eq.s32.totalorder %s667_s13, 1  ;;  %p90_p8 = scmp.eq.s32.totalorder %s420_s14, 1 }
   0xe   : > { %s867_s20 = scalar_select %p691_p6, 1, 0 }
   0xf   : > { %p421_p9 = scmp.ge.s32.totalorder %s622_s12, 1  ;;  %p97_p10 = scmp.lt.s32.totalorder %s622_s12, 3 }
  0x10   : > { %p698_p11 = por %p84_p7, %p54_p0  ;;  %p702_p12 = por %p90_p8, %p60_p3 }
  0x11   : > { %p706_p13 = pnand %p421_p9, %p97_p10  ;;  %p465_p4 = scmp.lt.s32.totalorder %s622_s12, 2 }
  0x12   : > { %s868_s21 = scalar_select %p698_p11, 1, 0 }
  0x13   : > { %s869_s22 = scalar_select %p702_p12, 1, 0 }
  0x14   : > { %p452_p2 = pneg %p706_p13  ;;  %s119_s24 = sand.u32 1, %s618_s11  }
  0x15   : > { %s441_s25 = smul.u32 384, %s622_s12  ;;  %p871_p6 = scmp.eq.s32.totalorder %s667_s13, 0 }
  0x16   : > { %p720_p7 = pnand %p465_p4, %p685_p5  ;;  %s440_s27 = smul.u32 24, %s119_s24 }
  0x17   : > { %p453_p0 = pnand %p452_p2, %p871_p6  ;;  %s509_s30 = scalar_lea.hbm %s860_s0, 16 }
  0x18   : > { %p510_p3 = scmp.ne.s32.totalorder %s860_s0, %s509_s30  ;;  %p516_p6 = scmp.lt.u32.totalorder %s509_s30, %s860_s0 }
  0x19   : > { %p511_p8 = pneg %p453_p0 }
  0x1b   : > { %p512_p9 = pnand %p511_p8, %p510_p3 }
  0x1d   : > { %p513_p10 = pneg %p512_p9 }
  0x1f   : > { %p518_p4 = pnand %p516_p6, %p513_p10 }
  0x21   : > { %521 = shalt.err (!%p518_p4)
}
  0x22   : > { %s624_s7 = smov [#allocation2]   ;;  %s739_s19 = scalar_lea.hbm %s861_s1, %s441_s25 }
  0x23   : > { %455 = dma.hbm_to_smem (!%p453_p0), %s860_s0, 16, %s624_s7, [#allocation5]  }
  0x24   : > { %s123_s28 = scalar_lea.vmem [#allocation6], %s440_s27  ;;  %s743_s30 = scalar_lea.sflag [#allocation3], %s119_s24 }
  0x25   : > { %s130_s29 = sshll.u32 %s123_s28, 4  ;;  %s522_s3 = scalar_lea.hbm %s739_s19, 384  ;;  %s741_s29 = int_to_ptr.vmem [resolvable:$true] %s130_s29 }
  0x26   : > { %p523_p5 = scmp.ne.s32.totalorder %s739_s19, %s522_s3  ;;  %p524_p2 = pneg %p720_p7 }
  0x27   : > { %s527_s5 = scalar_lea.hbm %s861_s1, 768  ;;  %p528_p8 = scmp.lt.u32.totalorder %s739_s19, %s861_s1 }
  0x28   : > { %p525_p0 = pnand %p524_p2, %p523_p5  ;;  %p529_p9 = scmp.lt.u32.totalorder %s527_s5, %s522_s3 }
  0x29   : > { %p531_p6 = scmp.lt.u32.totalorder %s522_s3, %s739_s19 }
  0x2a   : > { %p526_p3 = pneg %p525_p0  ;;  %p530_p10 = por %p529_p9, %p528_p8 }
  0x2c   : > { %p532_p4 = por %p531_p6, %p530_p10 }
  0x2e   : > { %p533_p1 = pnand %p532_p4, %p526_p3 }
  0x30   : > { %536 = shalt.err (!%p533_p1)
}
  0x31   : > { %s537_s24 = scalar_lea.vmem %s741_s29, 384  ;;  %s625_s27 = smov [#allocation6]  }
  0x32   : > { %p538_p5 = scmp.ne.s32.totalorder %s741_s29, %s537_s24  ;;  %s542_s8 = sshll.u32 %s625_s27, 4  ;;  %s543_s8 = int_to_ptr.vmem [resolvable:$false] %s542_s8 }
  0x33   : > { %s544_s14 = scalar_lea.vmem %s543_s8, 768  ;;  %p545_p11 = scmp.lt.s32.totalorder %s741_s29, %s543_s8 }
  0x34   : > { %p540_p0 = pnand %p538_p5, %p524_p2  ;;  %p546_p8 = scmp.lt.s32.totalorder %s544_s14, %s537_s24 }
  0x36   : > { %p541_p12 = pneg %p540_p0  ;;  %p547_p9 = por %p546_p8, %p545_p11 }
  0x38   : > { %p548_p10 = pnand %p547_p9, %p541_p12 }
  0x3a   : > { %551 = shalt.err (!%p548_p10)
}
  0x3b   : > { %s626_s16 = smov 128   ;;  %s627_s17 = smov 8  }
  0x3c   : > { %459 = dma.hbm_to_vmem [thread:$0]  (!%p720_p7), %s739_s19, 384, %s741_s29, %s743_s30, %s626_s16, %s626_s16, %s627_s17  }
  0x3d   : > { %142 = sbr.rel (%p706_p13) target bundleno = 343 (0x157), region = 28  ;;  %p873_p1 = scmp.eq.s32.totalorder (!%p706_p13), %s667_s13, 0 }
  0x44   : > { %597 = dma.done.wait (%p873_p1), [#allocation5], 16   ;;  %p874_p2 = pmov %p873_p1 }
  0x45   : > { %s778_s28 = sand.u32 1, %s614_s10   ;;  %p875_p11 = scmp.ne.s32.totalorder %s867_s20, 0 }
  0x46   : > { %599 = vsyncadd (%p874_p2), [#allocation5], 4294967280  ;;  %s442_s3 = smul.u32 24, %s778_s28  ;;  %s149_s25 = scalar_lea.sflag [#allocation3], %s778_s28 }
  0x48   : > { %s152_s26 = scalar_lea.vmem [#allocation6], %s442_s3 }
  0x49   : > { %601 = dma.done.wait (%p875_p11), %s149_s25, 384  }
  0x4a   : > { %603 = vsyncadd (%p875_p11), %s149_s25, 4294966912 }
  0x4b   : > { %157 = sfence }
  0x4c   : > { %v174_v0 = vld [vmem:[%s152_s26] sm:$0xff]  ;;  %v427_v1 = vld [vmem:[%s152_s26 + $0x8] sm:$0xff]  ;;  %v428_v2 = vld [vmem:[%s152_s26 + $0x10] sm:$0xff]  ;;  %s429_s20 = sld [smem:[#allocation2 + $0x3]]  ;;  %s433_s23 = sld [smem:[#allocation2 + $0x1]] }
  0x4d   : > { %v180_v3 = vmax.f32 %v174_v0, %v427_v1  ;;  %v182_v4 = vmin.f32 %v174_v0, %v427_v1  ;;  %s283_s29 = sld [smem:[#allocation2]]  ;;  %s434_s30 = sld [smem:[#allocation2 + $0x2]] }
  0x4e   : > { %s443_s5 = smul.u32 384, %s667_s13  ;;  %s173_s6 = scalar_lea.vmem [#allocation7], %s442_s3 }
  0x4f   : > { %v788_v5 = vmax.f32 %v180_v3, %v428_v2  ;;  %v183_v6 = vmin.f32 %v182_v4, %v428_v2  ;;  %s335_s7 = sshll.u32 %s173_s6, 4  ;;  %s322_s13 = scalar_lea.sflag [#allocation4], %s778_s28  ;;  %s816_s7 = int_to_ptr.vmem [resolvable:$true] %s335_s7 }
  0x50   : > { %s814_s8 = scalar_lea.hbm %s862_s2, %s443_s5  ;;  %s552_s14 = scalar_lea.vmem %s816_s7, 384 }
  0x51   : > { %vm184_vm0 = vcmp.eq.f32.partialorder %v788_v5, %v183_v6  ;;  %v185_v7 = vsub.f32 %v788_v5, %v183_v6  ;;  %v191_v9 = vsub.f32 %v788_v5, %v174_v0  ;;  %v193_v10 = vsub.f32 %v788_v5, %v427_v1  ;;  %p553_p12 = scmp.ne.s32.totalorder %s816_s7, %s552_s14  ;;  %p876_p13 = scmp.ne.s32.totalorder %s868_s21, 0 }
  0x52   : > { %v195_v11 = vsub.f32 %v788_v5, %v428_v2  ;;  %vm200_vm1 = vcmp.eq.f32.partialorder %v788_v5, %v427_v1  ;;  %vm201_vm2 = vcmp.ne.f32.partialorder %v788_v5, %v174_v0  ;;  %vm206_vm3 = vcmp.ne.f32.partialorder %v788_v5, %v427_v1  ;;  %s267_s19 = ssub.f32 1.0, %s433_s23  ;;  %s628_s16 = smov [#allocation7]  }
  0x53   : > { %v188_v8 = vsel %vm184_vm0, 1.0, %v185_v7  ;;  %vm197_vm4 = vcmp.eq.f32.partialorder %v788_v5, %v174_v0  ;;  %vm202_vm5 = vmand %vm200_vm1, %vm201_vm2  ;;  %v186_v28 = vsel %vm184_vm0, 1.0, %v788_v5  ;;  %v216_v29 = vstv %s429_s20  ;;  %s295_s4 = ssub.f32 1.0, %s434_s30  ;;  %p554_p7 = pnand %p553_p12, %p876_p13 }
  0x54   : > { %505 = vrcp.f32 %v188_v8  ;;  %vm207_vm6 = vmand %vm206_vm3, %vm201_vm2  ;;  %s556_s17 = sshll.u32 %s628_s16, 4  ;;  %s557_s17 = int_to_ptr.vmem [resolvable:$false] %s556_s17 }
  0x55   : > { %507 = vrcp.f32 %v186_v28  ;;  %p555_p3 = pneg %p554_p7  ;;  %s558_s3 = scalar_lea.vmem %s557_s17, 768 }
  0x56   : > { %p559_p6 = scmp.lt.s32.totalorder %s816_s7, %s557_s17  ;;  %p560_p4 = scmp.lt.s32.totalorder %s558_s3, %s552_s14 }
  0x58   : > { %p561_p5 = por %p560_p4, %p559_p6 }
  0x5a   : > { %p562_p0 = pnand %p561_p5, %p555_p3 }
  0x5e   : > { %v506_v12 = vpop.eup %505 }
  0x5f   : > { %v192_v13 = vmul.f32 %v506_v12, %v191_v9  ;;  %v194_v14 = vmul.f32 %v506_v12, %v193_v10  ;;  %v196_v15 = vmul.f32 %v506_v12, %v195_v11  ;;  %v508_v38 = vpop.eup %507 }
  0x60   : > { %v190_v44 = vmul.f32 %v508_v38, %v185_v7 }
  0x61   : > { %v198_v16 = vsub.f32 %v196_v15, %v194_v14  ;;  %v203_v17 = vadd.f32 2.0, %v192_v13  ;;  %v208_v18 = vadd.f32 4.0, %v194_v14 }
  0x62   : > { %v221_v52 = vmul.f32 %v190_v44, %v788_v5  ;;  %v303_v44 = vstv %s434_s30 }
  0x63   : > { %v199_v19 = vsel %vm197_vm4, %v198_v16, 0.0  ;;  %v204_v20 = vsub.f32 %v203_v17, %v196_v15  ;;  %v209_v21 = vsub.f32 %v208_v18, %v192_v13  ;;  %v270_v13 = vstv %s433_s23 }
  0x64   : > { %v268_v15 = vstv %s267_s19 }
  0x65   : > { %v205_v22 = vsel %vm202_vm5, %v204_v20, 0.0  ;;  %v210_v23 = vsel %vm207_vm6, %v209_v21, 0.0 }
  0x66   : > { %v211_v24 = vadd.f32 %v205_v22, %v199_v19 }
  0x68   : > { %v212_v25 = vadd.f32 %v211_v24, %v210_v23 }
  0x6a   : > { %v213_v26 = vmul.f32 0.16666667, %v212_v25 }
  0x6c   : > { %v214_v27 = vfloor.f32 %v213_v26 }
  0x6e   : > { %v215_v30 = vsub.f32 %v213_v26, %v214_v27  ;;  %v284_v26 = vstv %s283_s29 }
  0x70   : > { %v217_v31 = vadd.f32 %v216_v29, %v215_v30 }
  0x72   : > { %v218_v32 = vfloor.f32 %v217_v31 }
  0x74   : > { %v219_v33 = vsub.f32 %v217_v31, %v218_v32 }
  0x76   : > { %v220_v34 = vmul.f32 6.0, %v219_v33 }
  0x78   : > { %v222_v35 = vadd.f32 5.0, %v220_v34  ;;  %v232_v36 = vadd.f32 3.0, %v220_v34  ;;  %v242_v37 = vadd.f32 1.0, %v220_v34 }
  0x7a   : > { %vm223_vm7 = vcmp.ge.f32.partialorder %v222_v35, 6.0  ;;  %v430_v39 = vadd.f32 -6.0, %v222_v35  ;;  %vm233_vm8 = vcmp.ge.f32.partialorder %v232_v36, 6.0  ;;  %v431_v40 = vadd.f32 -6.0, %v232_v36 }
  0x7b   : > { %vm243_vm9 = vcmp.ge.f32.partialorder %v242_v37, 6.0  ;;  %v432_v41 = vadd.f32 -6.0, %v242_v37 }
  0x7c   : > { %v225_v42 = vsel %vm223_vm7, %v430_v39, %v222_v35  ;;  %v235_v43 = vsel %vm233_vm8, %v431_v40, %v232_v36 }
  0x7d   : > { %v226_v45 = vsub.f32 4.0, %v225_v42  ;;  %v236_v46 = vsub.f32 4.0, %v235_v43  ;;  %v245_v47 = vsel %vm243_vm9, %v432_v41, %v242_v37 }
  0x7e   : > { %v246_v48 = vsub.f32 4.0, %v245_v47 }
  0x7f   : > { %v227_v49 = vmin.f32 %v225_v42, %v226_v45  ;;  %v237_v50 = vmin.f32 %v235_v43, %v236_v46  ;;  %v301_v43 = vstv %s295_s4 }
  0x80   : > { %v247_v51 = vmin.f32 %v245_v47, %v246_v48 }
  0x81   : > { %v228_v53 = vmax.f32 %v227_v49, 0.0  ;;  %v238_v54 = vmax.f32 %v237_v50, 0.0 }
  0x82   : > { %v248_v55 = vmax.f32 %v247_v51, 0.0 }
  0x83   : > { %v229_v56 = vmin.f32 %v228_v53, 1.0  ;;  %v239_v57 = vmin.f32 %v238_v54, 1.0 }
  0x84   : > { %v249_v58 = vmin.f32 %v248_v55, 1.0 }
  0x85   : > { %v230_v59 = vmul.f32 %v229_v56, %v221_v52  ;;  %v240_v60 = vmul.f32 %v239_v57, %v221_v52 }
  0x86   : > { %v250_v61 = vmul.f32 %v249_v58, %v221_v52 }
  0x87   : > { %v231_v62 = vsub.f32 %v788_v5, %v230_v59  ;;  %v241_v63 = vsub.f32 %v788_v5, %v240_v60 }
  0x88   : > { %v251_v0 = vsub.f32 %v788_v5, %v250_v61 }
  0x89   : > { %v253_v1 = vmul.f32 0.2989, %v231_v62  ;;  %v254_v2 = vmul.f32 0.587, %v241_v63  ;;  %v271_v16 = vmul.f32 %v270_v13, %v231_v62  ;;  %v275_v5 = vmul.f32 %v270_v13, %v241_v63 }
  0x8a   : > { %v256_v3 = vmul.f32 0.114, %v251_v0  ;;  %v279_v17 = vmul.f32 %v270_v13, %v251_v0 }
  0x8b   : > { %v255_v4 = vadd.f32 %v254_v2, %v253_v1 }
  0x8d   : > { %v257_v6 = vadd.f32 %v256_v3, %v255_v4 }
  0x8f   : > { %258 = vadd.xlane.f32.xlu0 %v257_v6 }
 0x11c   : > { %v259_v7 = vpop.xlane.xlu0 %258 }
 0x11d   : > { %v260_v8 = vrot.slane %v259_v7, 4 }
 0x11f   : > { %v261_v9 = vadd.f32 %v260_v8, %v259_v7 }
 0x121   : > { %v262_v10 = vrot.slane %v261_v9, 2 }
 0x123   : > { %v263_v11 = vadd.f32 %v262_v10, %v261_v9 }
 0x125   : > { %v264_v12 = vrot.slane %v263_v11, 1 }
 0x127   : > { %v265_v14 = vadd.f32 %v264_v12, %v263_v11 }
 0x129   : > { %v266_v18 = vmul.f32 0.00390625, %v265_v14 }
 0x12b   : > { %v269_v19 = vmul.f32 %v268_v15, %v266_v18 }
 0x12d   : > { %v272_v20 = vadd.f32 %v271_v16, %v269_v19  ;;  %v276_v21 = vadd.f32 %v275_v5, %v269_v19  ;;  %v280_v22 = vadd.f32 %v279_v17, %v269_v19 }
 0x12f   : > { %v273_v23 = vmax.f32 %v272_v20, 0.0  ;;  %v277_v24 = vmax.f32 %v276_v21, 0.0  ;;  %v281_v25 = vmax.f32 %v280_v22, 0.0 }
 0x131   : > { %v274_v27 = vmin.f32 %v273_v23, 1.0  ;;  %v278_v28 = vmin.f32 %v277_v24, 1.0  ;;  %v282_v29 = vmin.f32 %v281_v25, 1.0 }
 0x133   : > { %v285_v30 = vmul.f32 %v284_v26, %v274_v27  ;;  %v288_v31 = vmul.f32 %v284_v26, %v278_v28  ;;  %v291_v32 = vmul.f32 %v284_v26, %v282_v29 }
 0x135   : > { %v286_v33 = vmax.f32 %v285_v30, 0.0  ;;  %v289_v34 = vmax.f32 %v288_v31, 0.0  ;;  %v292_v35 = vmax.f32 %v291_v32, 0.0 }
 0x137   : > { %v287_v36 = vmin.f32 %v286_v33, 1.0  ;;  %v290_v37 = vmin.f32 %v289_v34, 1.0  ;;  %v293_v38 = vmin.f32 %v292_v35, 1.0 }
 0x139   : > { %v296_v39 = vmul.f32 0.2989, %v287_v36  ;;  %v297_v40 = vmul.f32 0.587, %v290_v37  ;;  %v299_v42 = vmul.f32 0.114, %v293_v38  ;;  %v304_v47 = vmul.f32 %v303_v44, %v287_v36 }
 0x13a   : > { %v308_v48 = vmul.f32 %v303_v44, %v290_v37  ;;  %v312_v49 = vmul.f32 %v303_v44, %v293_v38 }
 0x13b   : > { %v298_v41 = vadd.f32 %v297_v40, %v296_v39 }
 0x13d   : > { %v300_v45 = vadd.f32 %v299_v42, %v298_v41 }
 0x13f   : > { %v302_v46 = vmul.f32 %v301_v43, %v300_v45 }
 0x141   : > { %v305_v50 = vadd.f32 %v304_v47, %v302_v46  ;;  %v309_v51 = vadd.f32 %v308_v48, %v302_v46  ;;  %v313_v52 = vadd.f32 %v312_v49, %v302_v46 }
 0x143   : > { %v306_v53 = vmax.f32 %v305_v50, 0.0  ;;  %v310_v54 = vmax.f32 %v309_v51, 0.0  ;;  %v314_v55 = vmax.f32 %v313_v52, 0.0 }
 0x145   : > { %v307_v56 = vmin.f32 %v306_v53, 1.0  ;;  %v311_v57 = vmin.f32 %v310_v54, 1.0  ;;  %v315_v58 = vmin.f32 %v314_v55, 1.0 }
 0x147   : > { %316 = vst [vmem:[%s173_s6] sm:$0xff] %v307_v56  ;;  %435 = vst [vmem:[%s173_s6 + $0x8] sm:$0xff] %v311_v57 }
 0x148   : > { %436 = vst [vmem:[%s173_s6 + $0x10] sm:$0xff] %v315_v58 }
 0x149   : > { %565 = shalt.err (!%p562_p0)
}
 0x14a   : > { %s566_s25 = scalar_lea.hbm %s814_s8, 384  ;;  %s570_s23 = scalar_lea.hbm %s862_s2, 768 }
 0x14b   : > { %p567_p8 = scmp.ne.s32.totalorder %s814_s8, %s566_s25  ;;  %p571_p1 = scmp.lt.u32.totalorder %s814_s8, %s862_s2 }
 0x14c   : > { %p572_p2 = scmp.lt.u32.totalorder %s570_s23, %s566_s25  ;;  %p574_p12 = scmp.lt.u32.totalorder %s566_s25, %s814_s8 }
 0x14d   : > { %p568_p9 = pnand %p567_p8, %p876_p13 }
 0x14e   : > { %p573_p11 = por %p572_p2, %p571_p1 }
 0x14f   : > { %p569_p10 = pneg %p568_p9 }
 0x150   : > { %p575_p7 = por %p574_p12, %p573_p11 }
 0x152   : > { %p576_p3 = pnand %p575_p7, %p569_p10 }
 0x154   : > { %579 = shalt.err (!%p576_p3)
}
 0x155   : > { %s629_s30 = smov 128   ;;  %s630_s4 = smov 8  }
 0x156   : > { %450 = dma.vmem_to_hbm [thread:$0]  (%p876_p13), %s816_s7, 384, %s814_s8, %s322_s13, %s629_s30, %s629_s30, %s630_s4  }
 0x157 PF: > { %s350_s5 = sand.u32 1, %s610_s9   ;;  %p877_p6 = scmp.ne.s32.totalorder %s869_s22, 0 }
 0x158   : > { %p878_p4 = scmp.ge.s32.totalorder %s622_s12, 2  ;;  %s351_s6 = scalar_lea.sflag [#allocation4], %s350_s5 }
 0x15a   : > { %p461_p5 = pnand %p878_p4, %p877_p6 }
 0x15c   : > { %605 = dma.done.wait (!%p461_p5), %s351_s6, 384  }
 0x15d   : > { %607 = vsyncadd (!%p461_p5), %s351_s6, 4294966912  ;;  %p16_p0 = scmp.ge.s32.totalorder %s671_s15, 4   ;;  %s879_s9 = smov %s614_s10 }
 0x15e   : > { %s880_s10 = smov %s618_s11  ;;  %s881_s11 = smov %s683_s18 }
 0x15f   : > { %s882_s12 = smov %s671_s15  ;;  %18 = sbr.rel (!%p16_p0) target bundleno = 6 (0x6), region = 82 }
 0x166   :  { %356 = vsyncpa [#allocation3], 1 }
 0x167   :  { %358 = vsyncpa [#allocation3 + $0x1], 1 }
 0x168   :  { %359 = vsyncpa [#allocation4], 1 }
 0x169   :  { %361 = vsyncpa [#allocation4 + $0x1], 1 }
 0x16a   :  { %362 = vsyncpa [#allocation5], 1 }
 0x16b   :  { %364 = vsyncpa [#allocation5 + $0x1], 1 }

</bundles_post_ra>
